<compile_context>
chip_gen: v5e
topology: v5e:2x2
jax: 0.10.0
libtpu: 0.0.40
codegen_flags: <defaults>
</compile_context>

<pallas_src>
import functools

import jax
import jax.numpy as jnp
from jax.experimental import pallas as pl
from jax.experimental.pallas import tpu as pltpu


def _round_up(x, m):
    return ((x + m - 1) // m) * m


def _vmem_capacity_bytes():
    """Generation-aware VMEM size (v5e/v6e: 128 MiB, v7x: 64 MiB per TC)."""
    try:
        info = pltpu.get_tpu_info()
        cap = getattr(info, "vmem_capacity_bytes", None)
        if cap:
            return int(cap)
    except Exception:
        pass
    return 64 << 20  # conservative default, safe on every generation


def _nconv_matmul_kernel(at_ref, x_ref, o_ref):
    # at_ref: (Wp, Vp)  A^T, resident in VMEM (constant index_map -> no re-DMA)
    # x_ref : (Vp, TM)  lane-dense tile of X2D
    # o_ref : (Wp, TM)  lane-dense output tile of O2D = A^T @ X2D
    o_ref[...] = jnp.dot(
        at_ref[...], x_ref[...], preferred_element_type=jnp.float32
    ).astype(o_ref.dtype)


@functools.partial(jax.jit, static_argnames=("tile_m", "use_bf16", "force_pallas"))
def nconv(x, A, *, tile_m=None, use_bf16=False, force_pallas=False):
    """x: (N, C, V, L), A: (V, W) -> (N, C, W, L); same math as the torch einsum."""
    N, C, V, L = x.shape
    V_a, W = A.shape
    assert V_a == V
    out_dtype = x.dtype

    # ---- tiny-problem fallback: launch/layout overhead would dominate -------
    if not force_pallas and x.size * x.dtype.itemsize < (1 << 20):
        return jnp.einsum("ncvl,vw->ncwl", x, A)

    compute_dtype = jnp.bfloat16 if use_bf16 else out_dtype
    itemsize = jnp.dtype(compute_dtype).itemsize
    sublane = 8 * (4 // itemsize)  # 8 rows for f32, 16 for bf16 (packing)

    # ---- reformulate as one lane-dense 2-D matmul ---------------------------
    M = N * C * L
    x2d = jnp.transpose(x, (2, 0, 1, 3)).reshape(V, M).astype(compute_dtype)
    at = A.T.astype(compute_dtype)  # (W, V)

    # ---- padding: sublane-tight V/W, M only to the 128-lane rule ------------
    Vp = _round_up(V, sublane)
    Wp = _round_up(W, sublane)
    Mp = _round_up(M, 128)
    x2d = jnp.pad(x2d, ((0, Vp - V), (0, Mp - M)))
    at = jnp.pad(at, ((0, Wp - W), (0, Vp - V)))

    # ---- adaptive M tile -----------------------------------------------------
    #  a) fit a generation-aware VMEM budget (double-buffered x/out tiles +
    #     resident A^T + margin) at ~3/4 of physical per-core VMEM,
    #  b) move ~8 MiB of HBM traffic per grid step (fixed ~0.35 us step
    #     overhead becomes <1%) while leaving enough steps for overlap,
    #  c) keep >= 2 grid steps when possible (megacore sharding on v7x).
    vmem_cap = _vmem_capacity_bytes()
    vmem_budget = (vmem_cap * 3) // 4
    resident = 2 * Wp * Vp * itemsize
    margin = 4 << 20
    per_col = 2 * (Vp + Wp) * itemsize          # double-buffered x + out columns
    tm_vmem = max(128, (vmem_budget - margin - resident) // per_col)
    tm_traffic = max(128, (8 << 20) // ((Vp + Wp) * itemsize))
    tm = min(tm_vmem, tm_traffic)
    if tile_m is not None:
        tm = min(tile_m, tm_vmem)               # never let a manual tile blow VMEM
    tm = min(tm, _round_up(-(-Mp // 2), 128))   # >= 2 steps when Mp allows
    tm = min(tm, Mp)
    tm = max(128, (tm // 128) * 128)            # (8,128) lane rule
    if tm >= 1024:
        tm = (tm // 512) * 512                  # MXU-friendly cadence for big tiles

    grid_m = pl.cdiv(Mp, tm)                    # last tile may be partial (clipped)

    vmem_needed = per_col * tm + resident + margin
    vmem_limit = int(min(max(vmem_needed, 32 << 20), vmem_cap - (4 << 20)))

    out2d = pl.pallas_call(
        _nconv_matmul_kernel,
        out_shape=jax.ShapeDtypeStruct((Wp, Mp), compute_dtype),
        grid_spec=pltpu.PrefetchScalarGridSpec(
            num_scalar_prefetch=0,
            grid=(grid_m,),
            in_specs=[
                pl.BlockSpec((Wp, Vp), lambda m: (0, 0)),   # A^T, resident
                pl.BlockSpec((Vp, tm), lambda m: (0, m)),   # streaming x lane tile
            ],
            out_specs=pl.BlockSpec((Wp, tm), lambda m: (0, m)),
        ),
        compiler_params=pltpu.CompilerParams(
            dimension_semantics=("parallel",),   # shard M tiles across v7x's 2 TCs
            vmem_limit_bytes=vmem_limit,
        ),
    )(at, x2d)

    # ---- un-pad and restore the NCWL layout (XLA-side layout plumbing) ------
    out = out2d[:W, :M].reshape(W, N, C, L)
    out = jnp.transpose(out, (1, 2, 0, 3))
    return out.astype(out_dtype)


if __name__ == "__main__":
    key = jax.random.PRNGKey(0)
    kx, ka, kx2, ka2 = jax.random.split(key, 4)

    # Case 1: small shapes (single tile), forced through the Pallas path.
    N, C, V, L = 2, 4, 16, 16
    W = V  # adjacency over the same node set
    x = jax.random.normal(kx, (N, C, V, L), dtype=jnp.float32)
    A = jax.random.normal(ka, (V, W), dtype=jnp.float32)
    out = jax.block_until_ready(nconv(x, A, force_pallas=True))
    ref = jnp.einsum("ncvl,vw->ncwl", x, A)
    assert out.shape == (N, C, W, L)
    assert jnp.allclose(out, ref, atol=1e-4, rtol=1e-4)

    # Case 2: multi-tile grid (resident A^T + parallel M tiles).
    N2, C2, V2, L2 = 2, 8, 16, 32
    W2 = V2
    x2 = jax.random.normal(kx2, (N2, C2, V2, L2), dtype=jnp.float32)
    A2 = jax.random.normal(ka2, (V2, W2), dtype=jnp.float32)
    out2 = jax.block_until_ready(nconv(x2, A2, force_pallas=True))
    ref2 = jnp.einsum("ncvl,vw->ncwl", x2, A2)
    assert out2.shape == (N2, C2, W2, L2)
    assert jnp.allclose(out2, ref2, atol=1e-4, rtol=1e-4)

    # Case 3: bf16 I/O path (f32 MXU accumulation kept inside the kernel).
    out_bf = jax.block_until_ready(nconv(x2, A2, force_pallas=True, use_bf16=True))
    assert out_bf.dtype == x2.dtype
    assert jnp.allclose(out_bf, ref2, atol=2.5e-1, rtol=1e-1)

    # Case 4: tiny-problem fallback (einsum path, no Pallas launch).
    out_fb = jax.block_until_ready(nconv(x, A))
    assert jnp.allclose(out_fb, ref, atol=1e-4, rtol=1e-4)

    print("KERNEL_OK")
</pallas_src>

<mosaic_0001>
module attributes {stable_mosaic.version = 11 : i64} {
  func.func @_nconv_matmul_kernel(%arg0: i32, %arg1: memref<16x16xf32, #tpu.memory_space<vmem>>, %arg2: memref<16x128xf32, #tpu.memory_space<vmem>>, %arg3: memref<16x128xf32, #tpu.memory_space<vmem>>) attributes {dimension_semantics = [#tpu.dimension_semantics<parallel>], iteration_bounds = array<i64: 1>, scalar_prefetch = 0 : i64, scratch_operands = 0 : i64, tpu.core_type = #tpu.core_type<tc>, window_params = [{pipeline_mode = #tpu.pipeline_mode<synchronous>, transform_indices = @transform_0, window_bounds = array<i64: 16, 16>}, {transform_indices = @transform_1, window_bounds = array<i64: 16, 128>}, {transform_indices = @transform_2, window_bounds = array<i64: 16, 128>}]} {
    %c0 = arith.constant 0 : index
    %c0_0 = arith.constant 0 : index
    %0 = vector.load %arg1[%c0, %c0_0] : memref<16x16xf32, #tpu.memory_space<vmem>>, vector<16x16xf32>
    %c0_1 = arith.constant 0 : index
    %c0_2 = arith.constant 0 : index
    %1 = vector.load %arg2[%c0_1, %c0_2] : memref<16x128xf32, #tpu.memory_space<vmem>>, vector<16x128xf32>
    %cst = arith.constant dense<0.000000e+00> : vector<16x128xf32>
    %2 = tpu.matmul %0, %1, %cst {dimension_numbers = #tpu.dot_dimension_numbers<[1], [0], [0], [1], [0, 0, 1, 1], [], []>} : vector<16x16xf32>, vector<16x128xf32>, vector<16x128xf32> -> vector<16x128xf32>
    %c0_3 = arith.constant 0 : index
    %c0_4 = arith.constant 0 : index
    %3 = vector.load %arg3[%c0_3, %c0_4] : memref<16x128xf32, #tpu.memory_space<vmem>>, vector<16x128xf32>
    tpu.vector_store %arg3[%c0_3, %c0_4], %2 {strides = array<i32>} : memref<16x128xf32, #tpu.memory_space<vmem>>, vector<16x128xf32>,
    return
  }
  func.func @transform_0(%arg0: i32) -> (i32, i32) {
    %c0_i32 = arith.constant 0 : i32
    %c0_i32_0 = arith.constant 0 : i32
    %c0_i32_1 = arith.constant 0 : i32
    return %c0_i32, %c0_i32_0 : i32, i32
  }
  func.func @transform_1(%arg0: i32) -> (i32, i32) {
    %c0_i32 = arith.constant 0 : i32
    %c0_i32_0 = arith.constant 0 : i32
    return %c0_i32, %arg0 : i32, i32
  }
  func.func @transform_2(%arg0: i32) -> (i32, i32) {
    %c0_i32 = arith.constant 0 : i32
    %c0_i32_0 = arith.constant 0 : i32
    return %c0_i32, %arg0 : i32, i32
  }
}

</mosaic_0001>

<bundles_post_ra>
// kernel: nconv.1
= control target key start
LH: loop header
LB: loop body
LE: loop exit
PB: predicated region body
PF: predicated region fallthrough
CT: control target
= control target key end

     0   :  { %vm15_vm0 = vcmask 130048   ;;  %s88_s1 = inlined_call_operand.vmem [shape: f32[16,128], index: 1, kind: input, shape index: {}]   ;;  %s89_s0 = inlined_call_operand.vmem [shape: f32[16,16], index: 0, kind: input, shape index: {}]   ;;  %s90_s2 = inlined_call_operand.vmem [shape: f32[16,128], index: 2, kind: output, shape index: {}]  }
   0x1   :  { %v14_v0 = vld [vmem:[%s88_s1 + $0x8] sm:$0xff]  ;;  %v13_v1 = vld [vmem:[%s88_s1] sm:$0xff] }
   0x2   :  { %36 = vmatpush.msra.mxu0 %v14_v0  ;;  %53 = vmatpush.msra.mxu1 %v14_v0  ;;  %v11_v2 = vld [vmem:[%s89_s0] sm:$0xff]  ;;  %v12_v3 = vld [vmem:[%s89_s0 + $0x8] sm:$0xff] }
   0x4   :  { %37 = vmatpush.msra.mxu0 %v13_v1  ;;  %54 = vmatpush.msra.mxu1 %v13_v1 }
   0x5   :  { %51 = vmatmul.msk.f32.vlgmr.msra.gmra.mxu0 %vm15_vm0, %v11_v2  ;;  %52 = vmatmul.msk.f32.vlgmr.msra.gmra.mxu1 %vm15_vm0, %v12_v3 }
  0x82   :  { %v39_v4 = vpop.f32.mrf.mxu0  ;;  %v42_v5 = vpop.f32.mrf.mxu1 }
  0x83   :  { %45 = vst [vmem:[%s90_s2] sm:$0xff] %v39_v4 }
  0x84   :  { %46 = vst [vmem:[%s90_s2 + $0x8] sm:$0xff] %v42_v5 }

</bundles_post_ra>
